<compile_context>
chip_gen: v5e
topology: v5e:2x2
jax: 0.10.0
libtpu: 0.0.40
codegen_flags: <defaults>
</compile_context>

<pallas_src>
import jax
import jax.numpy as jnp
from jax.experimental import pallas as pl
from jax.experimental.pallas import tpu as pltpu


def _round_up(x, m):
    return (x + m - 1) // m * m


# ---------------------------------------------------------------------------
# Pallas kernel: one (row-tile, K-tile) step of   out = A @ xw + b
# ---------------------------------------------------------------------------
def _gcn_kernel(a_ref, xw_ref, b_ref, out_ref, acc_ref):
    k = pl.program_id(1)

    @pl.when(k == 0)
    def _():
        acc_ref[...] = jnp.zeros_like(acc_ref)

    # (tm, tk) bf16 @ (tk, out_pad) bf16 -> f32 accumulate on the MXU.
    acc_ref[...] += jnp.dot(a_ref[...], xw_ref[...],
                            preferred_element_type=jnp.float32)

    @pl.when(k == pl.num_programs(1) - 1)
    def _():
        out_ref[...] = (acc_ref[...] + b_ref[...]).astype(out_ref.dtype)


# ---------------------------------------------------------------------------
# Wrapper
# ---------------------------------------------------------------------------
def make_dropout_mask(key, shape, p, training):
    """Pre-scaled keep mask (1/(1-p) where kept, 0 where dropped)."""
    if training and p > 0.0:
        keep = jax.random.bernoulli(key, 1.0 - p, shape)
        return keep.astype(jnp.float32) / jnp.float32(1.0 - p)
    return jnp.ones(shape, jnp.float32)


def gcn_forward(x, a_norm, weight, bias, *, dropout_mask, tm=512, tk=512):
    """x: (N, in) f32, a_norm: (N, N) f32 dense normalized adjacency,
    weight: (in, out) f32, bias: (out,) f32, dropout_mask: (N, in) f32."""
    n_dst, n_src = a_norm.shape
    n, in_dim = x.shape
    assert n == n_src
    out_dim = weight.shape[1]

    # ---- Hoisted per-node work (once, not per row tile) --------------------
    # dropout -> feature transform; tiny (N,in)@(in,out) matmul done by XLA.
    xw = jnp.dot(x * dropout_mask, weight, precision=jax.lax.Precision.HIGHEST)

    # Lane-dense output: pad out_dim to a multiple of 128.
    out_pad = _round_up(out_dim, 128)

    # ---- Tiling -------------------------------------------------------------
    tm = max(8, _round_up(int(tm), 8))
    # Ensure >= 2 row tiles so the "parallel" axis can shard across both
    # v7x TensorCores (and still amortize per-step overhead on v5e/v6e).
    if n_dst > 8 and _round_up(n_dst, tm) // tm < 2:
        tm = _round_up((n_dst + 1) // 2, 8)
    n_dst_pad = _round_up(n_dst, tm)

    tk = max(128, _round_up(int(tk), 128))
    tk = min(tk, _round_up(n_src, 128))
    n_src_pad = _round_up(n_src, tk)

    # ---- Padded, pre-cast operands ------------------------------------------
    a_p = (
        jnp.zeros((n_dst_pad, n_src_pad), jnp.bfloat16)
        .at[:n_dst, :n_src]
        .set(a_norm.astype(jnp.bfloat16))
    )
    xw_p = (
        jnp.zeros((n_src_pad, out_pad), jnp.bfloat16)
        .at[:n_src, :out_dim]
        .set(xw.astype(jnp.bfloat16))
    )
    b_p = jnp.zeros((1, out_pad), jnp.float32).at[:, :out_dim].set(bias)

    grid = (n_dst_pad // tm, n_src_pad // tk)

    # Explicit VMEM budget: double-buffered A / xw / out tiles + f32 acc.
    est = (2 * tm * tk * 2 + 2 * tk * out_pad * 2 + 2 * tm * out_pad * 4
           + 2 * out_pad * 4 + tm * out_pad * 4)
    vmem_limit = int(min(48 * 2**20, max(32 * 2**20, 2 * est)))

    out = pl.pallas_call(
        _gcn_kernel,
        out_shape=jax.ShapeDtypeStruct((n_dst_pad, out_pad), jnp.float32),
        grid_spec=pltpu.PrefetchScalarGridSpec(
            num_scalar_prefetch=0,
            grid=grid,
            in_specs=[
                pl.BlockSpec((tm, tk), lambda i, k: (i, k)),         # A tile
                pl.BlockSpec((tk, out_pad), lambda i, k: (k, 0)),    # xw tile
                pl.BlockSpec((1, out_pad), lambda i, k: (0, 0)),     # bias
            ],
            out_specs=pl.BlockSpec((tm, out_pad), lambda i, k: (i, 0)),
            scratch_shapes=[pltpu.VMEM((tm, out_pad), jnp.float32)],
        ),
        compiler_params=pltpu.CompilerParams(
            dimension_semantics=("parallel", "arbitrary"),
            vmem_limit_bytes=vmem_limit,
        ),
    )(a_p, xw_p, b_p)

    return out[:n_dst, :out_dim]


# ---------------------------------------------------------------------------
# Glue: dense GCN-normalized adjacency  D^{-1/2} (A + I) D^{-1/2}
# (matches torch_geometric gcn_norm with add_self_loops=True, fill_value=1)
# ---------------------------------------------------------------------------
def gcn_norm_dense(edge_index, edge_weight, num_nodes):
    src = edge_index[0]
    dst = edge_index[1]
    if edge_weight is None:
        edge_weight = jnp.ones(src.shape[0], dtype=jnp.float32)
    adj = jnp.zeros((num_nodes, num_nodes), jnp.float32)
    adj = adj.at[dst, src].add(edge_weight)             # A[target, source] = w
    adj = adj + jnp.eye(num_nodes, dtype=jnp.float32)   # self loops, weight 1
    deg = adj.sum(axis=1)
    dis = jnp.where(deg > 0, jax.lax.rsqrt(deg), 0.0)
    return dis[:, None] * adj * dis[None, :]


def init_params(key, in_dim, out_dim):
    # Glorot-uniform weight (as in GCNConv), zero bias. Deterministic.
    bound = (6.0 / (in_dim + out_dim)) ** 0.5
    w = jax.random.uniform(key, (in_dim, out_dim), jnp.float32, -bound, bound)
    b = jnp.zeros((out_dim,), jnp.float32)
    return w, b


def _reference(x, mask, a_bf16, weight, bias):
    # Mirrors the kernel's quantization (bf16 A and bf16 xw, f32 accumulate).
    hp = jax.lax.Precision.HIGHEST
    xw = jnp.dot(x * mask, weight, precision=hp)
    xw_q = xw.astype(jnp.bfloat16).astype(jnp.float32)
    a = a_bf16.astype(jnp.float32)
    return jnp.dot(a, xw_q, precision=hp) + bias[None, :]


if __name__ == "__main__":
    key = jax.random.PRNGKey(0)
    k_x, k_w, k_d = jax.random.split(key, 3)

    N, IN_DIM, OUT_DIM = 256, 16, 32
    DROPOUT_P = 0.5
    TM, TK = 128, 128  # -> 2x2 grid: exercises both TCs and the K accumulator

    # Node features
    x = jax.random.normal(k_x, (N, IN_DIM), jnp.float32)

    # Simple bidirectional ring graph: i <-> (i+1) % N
    fwd = jnp.stack([jnp.arange(N), (jnp.arange(N) + 1) % N])
    bwd = jnp.stack([(jnp.arange(N) + 1) % N, jnp.arange(N)])
    edge_index = jnp.concatenate([fwd, bwd], axis=1)  # (2, 2N)
    edge_weight = None

    weight, bias = init_params(k_w, IN_DIM, OUT_DIM)
    a_norm = gcn_norm_dense(edge_index, edge_weight, N)
    a_bf16 = a_norm.astype(jnp.bfloat16)

    # --- Eval mode: dropout is identity -------------------------------------
    mask_eval = make_dropout_mask(k_d, x.shape, DROPOUT_P, training=False)
    out_eval = gcn_forward(x, a_norm, weight, bias,
                           dropout_mask=mask_eval, tm=TM, tk=TK)
    out_eval = jax.block_until_ready(out_eval)
    ref_eval = _reference(x, mask_eval, a_bf16, weight, bias)
    assert out_eval.shape == (N, OUT_DIM)
    assert jnp.allclose(out_eval, ref_eval, atol=1e-2, rtol=1e-2)

    # --- Training mode: deterministic dropout mask --------------------------
    mask_train = make_dropout_mask(k_d, x.shape, DROPOUT_P, training=True)
    out_train = gcn_forward(x, a_norm, weight, bias,
                            dropout_mask=mask_train, tm=TM, tk=TK)
    out_train = jax.block_until_ready(out_train)
    ref_train = _reference(x, mask_train, a_bf16, weight, bias)
    assert out_train.shape == (N, OUT_DIM)
    assert bool(jnp.all(jnp.isfinite(out_train)))
    assert jnp.allclose(out_train, ref_train, atol=1e-2, rtol=1e-2)

    print("KERNEL_OK")
</pallas_src>

<mosaic_0001>
module attributes {stable_mosaic.version = 11 : i64} {
  func.func @_gcn_kernel(%arg0: i32, %arg1: i32, %arg2: memref<128x128xbf16, #tpu.memory_space<vmem>>, %arg3: memref<128x128xbf16, #tpu.memory_space<vmem>>, %arg4: memref<1x128xf32, #tpu.memory_space<vmem>>, %arg5: memref<128x128xf32, #tpu.memory_space<vmem>>, %arg6: memref<128x128xf32, #tpu.memory_space<vmem>>) attributes {dimension_semantics = [#tpu.dimension_semantics<parallel>, #tpu.dimension_semantics<arbitrary>], iteration_bounds = array<i64: 2, 2>, scalar_prefetch = 0 : i64, scratch_operands = 1 : i64, tpu.core_type = #tpu.core_type<tc>, window_params = [{transform_indices = @transform_0, window_bounds = array<i64: 128, 128>}, {transform_indices = @transform_1, window_bounds = array<i64: 128, 128>}, {pipeline_mode = #tpu.pipeline_mode<synchronous>, transform_indices = @transform_2, window_bounds = array<i64: 1, 128>}, {transform_indices = @transform_3, window_bounds = array<i64: 128, 128>}]} {
    %c0_i32 = arith.constant 0 : i32
    %0 = arith.cmpi eq, %arg1, %c0_i32 : i32
    %1 = arith.extui %0 : i1 to i32
    %c0_i32_0 = arith.constant 0 : i32
    %2 = arith.cmpi ne, %1, %c0_i32_0 : i32
    scf.if %2 {
      %cst_9 = arith.constant 0.000000e+00 : f32
      %12 = vector.broadcast %cst_9 : f32 to vector<128x128xf32>
      %c0_10 = arith.constant 0 : index
      %c0_11 = arith.constant 0 : index
      %13 = vector.load %arg6[%c0_10, %c0_11] : memref<128x128xf32, #tpu.memory_space<vmem>>, vector<128x128xf32>
      tpu.vector_store %arg6[%c0_10, %c0_11], %12 {strides = array<i32>} : memref<128x128xf32, #tpu.memory_space<vmem>>, vector<128x128xf32>,
    } else {
    }
    %c0 = arith.constant 0 : index
    %c0_1 = arith.constant 0 : index
    %3 = vector.load %arg6[%c0, %c0_1] : memref<128x128xf32, #tpu.memory_space<vmem>>, vector<128x128xf32>
    %c0_2 = arith.constant 0 : index
    %c0_3 = arith.constant 0 : index
    %4 = vector.load %arg2[%c0_2, %c0_3] : memref<128x128xbf16, #tpu.memory_space<vmem>>, vector<128x128xbf16>
    %c0_4 = arith.constant 0 : index
    %c0_5 = arith.constant 0 : index
    %5 = vector.load %arg3[%c0_4, %c0_5] : memref<128x128xbf16, #tpu.memory_space<vmem>>, vector<128x128xbf16>
    %cst = arith.constant dense<0.000000e+00> : vector<128x128xf32>
    %6 = tpu.matmul %4, %5, %cst {dimension_numbers = #tpu.dot_dimension_numbers<[1], [0], [0], [1], [0, 0, 1, 1], [], []>} : vector<128x128xbf16>, vector<128x128xbf16>, vector<128x128xf32> -> vector<128x128xf32>
    %7 = arith.addf %3, %6 : vector<128x128xf32>
    %c0_6 = arith.constant 0 : index
    %c0_7 = arith.constant 0 : index
    %8 = vector.load %arg6[%c0_6, %c0_7] : memref<128x128xf32, #tpu.memory_space<vmem>>, vector<128x128xf32>
    tpu.vector_store %arg6[%c0_6, %c0_7], %7 {strides = array<i32>} : memref<128x128xf32, #tpu.memory_space<vmem>>, vector<128x128xf32>,
    %c1_i32 = arith.constant 1 : i32
    %9 = arith.cmpi eq, %arg1, %c1_i32 : i32
    %10 = arith.extui %9 : i1 to i32
    %c0_i32_8 = arith.constant 0 : i32
    %11 = arith.cmpi ne, %10, %c0_i32_8 : i32
    scf.if %11 {
      %c0_9 = arith.constant 0 : index
      %c0_10 = arith.constant 0 : index
      %12 = vector.load %arg6[%c0_9, %c0_10] : memref<128x128xf32, #tpu.memory_space<vmem>>, vector<128x128xf32>
      %c0_11 = arith.constant 0 : index
      %c0_12 = arith.constant 0 : index
      %13 = vector.load %arg4[%c0_11, %c0_12] : memref<1x128xf32, #tpu.memory_space<vmem>>, vector<1x128xf32>
      %14 = vector.broadcast %13 : vector<1x128xf32> to vector<128x128xf32>
      %15 = arith.addf %12, %14 : vector<128x128xf32>
      %c0_13 = arith.constant 0 : index
      %c0_14 = arith.constant 0 : index
      %16 = vector.load %arg5[%c0_13, %c0_14] : memref<128x128xf32, #tpu.memory_space<vmem>>, vector<128x128xf32>
      tpu.vector_store %arg5[%c0_13, %c0_14], %15 {strides = array<i32>} : memref<128x128xf32, #tpu.memory_space<vmem>>, vector<128x128xf32>,
    } else {
    }
    return
  }
  func.func @transform_0(%arg0: i32, %arg1: i32) -> (i32, i32) {
    %c0_i32 = arith.constant 0 : i32
    return %arg0, %arg1 : i32, i32
  }
  func.func @transform_1(%arg0: i32, %arg1: i32) -> (i32, i32) {
    %c0_i32 = arith.constant 0 : i32
    %c0_i32_0 = arith.constant 0 : i32
    return %arg1, %c0_i32 : i32, i32
  }
  func.func @transform_2(%arg0: i32, %arg1: i32) -> (i32, i32) {
    %c0_i32 = arith.constant 0 : i32
    %c0_i32_0 = arith.constant 0 : i32
    %c0_i32_1 = arith.constant 0 : i32
    return %c0_i32, %c0_i32_0 : i32, i32
  }
  func.func @transform_3(%arg0: i32, %arg1: i32) -> (i32, i32) {
    %c0_i32 = arith.constant 0 : i32
    %c0_i32_0 = arith.constant 0 : i32
    return %arg0, %c0_i32 : i32, i32
  }
}

</mosaic_0001>

<bundles_post_ra>
// kernel: tpu_custom_call.1
= control target key start
LH: loop header
LB: loop body
LE: loop exit
PB: predicated region body
PF: predicated region fallthrough
CT: control target
= control target key end

     0   :  { %s1486_s0 = inlined_call_operand.hbm [shape: bf16[256,256], index: 0, kind: input, shape index: {}]   ;;  %s1487_s1 = inlined_call_operand.hbm [shape: bf16[256,128], index: 1, kind: input, shape index: {}]   ;;  %s1488_s2 = inlined_call_operand.vmem [shape: f32[1,128], index: 2, kind: input, shape index: {}]   ;;  %s1489_s3 = inlined_call_operand.hbm [shape: f32[256,128], index: 3, kind: output, shape index: {}]  }
   0x1   :  { %1497 = sst [smem:[#allocation17_spill]] %s1486_s0 }
   0x2   :  { %1498 = sst [smem:[#allocation18_spill]] %s1487_s1 }
   0x3   :  { %1499 = sst [smem:[#allocation19_spill]] %s1488_s2 }
   0x4   :  { %1500 = sst [smem:[#allocation20_spill]] %s1489_s3 }
   0x5   :  { %8 = vsyncpa [#allocation4], 0 }
   0x6   :  { %10 = vsyncpa [#allocation4 + $0x1], 0 }
   0x7   :  { %11 = vsyncpa [#allocation7], 0 }
   0x8   :  { %13 = vsyncpa [#allocation7 + $0x1], 0 }
   0x9   :  { %14 = vsyncpa [#allocation5], 0 }
   0xa   :  { %16 = vsyncpa [#allocation5 + $0x1], 0  ;;  %s1183_s12 = smov 0   ;;  %s1185_s13 = smov 0  }
   0xb   :  { %s1187_s14 = smov 0   ;;  %s1189_s15 = smov 0  }
   0xc   :  { %s1191_s16 = smov 0   ;;  %s1193_s17 = smov 0  }
   0xd   :  { %s1195_s18 = smov 0   ;;  %s1197_s19 = smov 0  }
   0xe   :  { %s1199_s20 = smov 0   ;;  %s1201_s21 = smov 0  }
   0xf   :  { %s1203_s22 = smov 0   ;;  %s1205_s23 = smov 0  }
  0x10   :  { %s1207_s24 = smov 0   ;;  %s1209_s25 = smov 0  }
  0x11 LB: > { %1501 = sst [smem:[#allocation12_spill]] %s1139_s21  ;;  %s31_s26 = sadd.s32 1, %s1147_s23  ;;  %s1155_s25 = sphi %s1209_s25, %s22_s25   ;;  %s1151_s24 = sphi %s1207_s24, %s1526_s24   ;;  %s1147_s23 = sphi %s1205_s23, %s1537_s23   ;;  %s1143_s22 = sphi %s1203_s22, %s1524_s22   ;;  %s1139_s21 = sphi %s1201_s21, %s1536_s21   ;;  %s1135_s20 = sphi %s1199_s20, %s1535_s20   ;;  %s1131_s19 = sphi %s1197_s19, %s1534_s19   ;;  %s1127_s18 = sphi %s1195_s18, %s1533_s18   ;;  %s1123_s17 = sphi %s1193_s17, %s1532_s17   ;;  %s1119_s16 = sphi %s1191_s16, %s1531_s16   ;;  %s1115_s15 = sphi %s1189_s15, %s1530_s15   ;;  %s1111_s14 = sphi %s1187_s14, %s1529_s14   ;;  %s1107_s13 = sphi %s1185_s13, %s1528_s13   ;;  %s1103_s12 = sphi %s1183_s12, %s1527_s12  }
  0x12   : > { %1502 = sst [smem:[#allocation13_spill]] %s1143_s22  ;;  %s34_s27 = sadd.s32 1, %s1151_s24 }
  0x13   : > { %1503 = sst [smem:[#allocation14_spill]] %s1151_s24  ;;  %p32_p0 = scmp.ge.s32.totalorder %s31_s26, 2 }
  0x14   : > { %s43_s28 = sadd.s32 1, %s1135_s20  ;;  %p50_p1 = scmp.ne.s32.totalorder %s1135_s20, %s1131_s19 }
  0x15   : > { %p51_p2 = scmp.eq.s32.totalorder %s1155_s25, 0  ;;  %s1539_s26 = smov (%p32_p0, %s31_s26), 0 }
  0x16   : > { %1504 = sst [smem:[#allocation15_spill]] %s1539_s26  ;;  %s1541_s27 = smov (!%p32_p0, %s34_s27), %s1151_s24 }
  0x17   : > { %s1264_s29 = ssub.s32 %s1147_s23, %s1539_s26  ;;  %p1268_p3 = por %p51_p2, %p50_p1 }
  0x18   : > { %p36_p4 = scmp.ge.s32.totalorder %s1541_s27, 2  ;;  %p56_p5 = scmp.ne.s32.totalorder %s1131_s19, %s1127_s18 }
  0x19   : > { %p67_p6 = scmp.eq.s32.totalorder %s1264_s29, 0  ;;  %s116_s4 = sadd.s32 1, %s1111_s14 }
  0x1a   : > { %s1543_s27 = smov (%p36_p4, %s1541_s27), 0  ;;  %p1493_p7 = scmp.lt.s32.totalorder %s1155_s25, 4 }
  0x1b   : > { %1506 = sst [smem:[#allocation16_spill]] %s1543_s27  ;;  %s38_s5 = ssub.s32 %s1151_s24, %s1543_s27 }
  0x1c   : > { %s156_s6 = sand.u32 1, %s1135_s20   ;;  %s40_s7 = sor.u32 %s1264_s29, %s38_s5 }
  0x1d   : > { %p114_p8 = scmp.eq.s32.totalorder %s38_s5, 0  ;;  %p41_p9 = scmp.eq.s32.totalorder %s40_s7, 0 }
  0x1e   : > { %s682_s10 = sshll.u32 %s156_s6, 6  ;;  %s764_s11 = sshll.u32 %s1151_s24, 5 }
  0x1f   : > { %s1284_s8 = scalar_select %p114_p8, %s1111_s14, %s116_s4  }
  0x20   : > { %s1287_s9 = scalar_select %p41_p9, %s1135_s20, %s43_s28  }
  0x21   : > { %s165_s26 = sadd.s32 %s1147_s23, %s764_s11  ;;  %s160_s22 = scalar_lea.vmem [#allocation3], %s682_s10 }
  0x22   : > { %s685_s3 = sshll.u32 %s165_s26, 2  ;;  %s170_s27 = sshll.u32 %s160_s22, 4  ;;  %s171_s27 = int_to_ptr.vmem [resolvable:$true] %s170_s27 }
  0x23   : > { %s1507_s0 = sld [smem:[#allocation17_spill]]  ;;  %p814_p10 = pnand %p1493_p7, %p1268_p3 }
  0x24   : > { %p689_p11 = scmp.ge.s32.totalorder %s1155_s25, 1  ;;  %s157_s2 = scalar_lea.sflag [#allocation4], %s156_s6 }
  0x25   : > { %s1494_s21 = smov 64   ;;  %s1495_s22 = smov 4  }
  0x26   : > { %p200_p12 = scmp.lt.s32.totalorder %s1155_s25, 5  ;;  %s678_s26 = sadd.s32 4294967295, %s1155_s25  }
  0x27   : > { %s679_s28 = sadd.s32 4294967294, %s1155_s25   ;;  %p57_p0 = scmp.eq.s32.totalorder %s678_s26, 0 }
  0x28   : > { %p1302_p13 = pnand %p689_p11, %p200_p12  ;;  %s69_s30 = sadd.s32 1, %s1123_s17 }
  0x29   : > { %s167_s1 = scalar_lea.hbm %s1507_s0, %s685_s3  ;;  %s1157_s3 = smov 128  }
  0x2a   : > { %s168_s4 = sshll.u32 %s167_s1, 4  ;;  %p1317_p1 = por %p57_p0, %p56_p5  ;;  %s169_s4 = int_to_ptr.hbm [resolvable:$true] %s168_s4 }
  0x2b   : > { %816 = dma.hbm_to_vmem [thread:$0]  (!%p814_p10), %s169_s4, 1024, %s171_s27, %s157_s2, %s1157_s3, %s1494_s21, %s1495_s22  }
  0x2c   : > { %s1312_s5 = scalar_select %p67_p6, %s1123_s17, %s69_s30  }
  0x2d   : > { %p76_p3 = scmp.ne.s32.totalorder %s1123_s17, %s1119_s16  ;;  %p82_p4 = scmp.ne.s32.totalorder %s1119_s16, %s1115_s15 }
  0x2e   : > { %p126_p8 = scmp.ne.s32.totalorder %s1111_s14, %s1107_s13  ;;  %p127_p10 = scmp.eq.s32.totalorder %s678_s26, 3 }
  0x2f   : > { %p1329_p9 = por %p76_p3, %p51_p2  ;;  %p1333_p11 = por %p82_p4, %p57_p0 }
  0x30   : > { %p132_p6 = scmp.ne.s32.totalorder %s1107_s13, %s1103_s12  ;;  %p1339_p5 = por %p127_p10, %p126_p8 }
  0x31   : > { %p133_p12 = scmp.eq.s32.totalorder %s679_s28, 3  ;;  %s180_s15 = sand.u32 1, %s1123_s17  }
  0x32   : > { %s765_s7 = sshll.u32 %s1147_s23, 6  ;;  %s686_s11 = sshll.u32 %s180_s15, 6 }
  0x33   : > { %p1345_p7 = por %p133_p12, %p132_p6  ;;  %s1514_s3 = sld [smem:[#allocation18_spill]] }
  0x34   : > { %s184_s21 = scalar_lea.vmem [#allocation6], %s686_s11  ;;  %p1515_p2 = scmp.lt.s32.totalorder %s1155_s25, 4 }
  0x35   : > { %s192_s22 = sshll.u32 %s184_s21, 4  ;;  %s181_s28 = scalar_lea.sflag [#allocation7], %s180_s15  ;;  %s193_s22 = int_to_ptr.vmem [resolvable:$true] %s192_s22 }
  0x36   : > { %p817_p0 = pnand %p1515_p2, %p1329_p9  ;;  %s1516_s0 = smov 4  }
  0x37   : > { %s1517_s24 = smov 64   ;;  %204 = sbr.rel (%p1302_p13) target bundleno = 330 (0x14a), region = 32 }
  0x38   : > { %s206_s4 = sand.u32 (!%p1302_p13), 1, %s1131_s19  }
  0x39   : > { %s189_s26 = scalar_lea.hbm %s1514_s3, %s765_s7  ;;  %s690_s7 = sshll.u32 (!%p1302_p13), %s206_s4, 6 }
  0x3a   : > { %s190_s30 = sshll.u32 %s189_s26, 4  ;;  %s207_s2 = scalar_lea.sflag (!%p1302_p13), [#allocation4], %s206_s4  ;;  %s191_s30 = int_to_ptr.hbm [resolvable:$true] %s190_s30 }
  0x3b   : > { %819 = dma.hbm_to_vmem [thread:$0]  (!%p817_p0), %s191_s30, 1024, %s193_s22, %s181_s28, %s1517_s24, %s1517_s24, %s1516_s0  }
  0x3c   : > { %s1362_s3 = scalar_lea.vmem [#allocation3], %s690_s7 }
  0x3d   : > { %1090 = dma.done.wait (%p1317_p1), %s207_s2, 1024  }
  0x3e   : > { %1092 = vsyncadd (%p1317_p1), %s207_s2, 4294966272  ;;  %s216_s21 = sand.u32 1, %s1119_s16  }
  0x3f   : > { %s691_s27 = sshll.u32 %s216_s21, 6  ;;  %s217_s0 = scalar_lea.sflag [#allocation7], %s216_s21 }
  0x40   : > { %s1369_s24 = scalar_lea.vmem [#allocation6], %s691_s27 }
  0x41   : > { %1094 = dma.done.wait (%p1333_p11), %s217_s0, 1024  }
  0x42   : > { %1096 = vsyncadd (%p1333_p11), %s217_s0, 4294966272  ;;  %s246_s22 = sand.u32 1, %s1107_s13   ;;  %s1518_s6 = sld [smem:[#allocation12_spill]] }
  0x43   : > { %s692_s1 = sshll.u32 %s246_s22, 7 }
  0x44   : > { %s1378_s15 = scalar_lea.vmem [#allocation8], %s692_s1 }
  0x48   : > { %p693_p13 = scmp.ne.s32.totalorder %s1518_s6, 0 }
  0x4a   : > { %255 = sbr.rel (%p693_p13) target bundleno = 96 (0x60), region = 44 }
  0x4f   : > { %v1160_v0 = vmov 0.0  }
  0x50   : > { %256 = vst [vmem:[#allocation2 + $0x30] sm:$0xff] %v1160_v0 }
  0x51   : > { %257 = vst [vmem:[#allocation2] sm:$0xff] %v1160_v0 }
  0x52   : > { %258 = vst [vmem:[#allocation2 + $0x58] sm:$0xff] %v1160_v0 }
  0x53   : > { %259 = vst [vmem:[#allocation2 + $0x18] sm:$0xff] %v1160_v0 }
  0x54   : > { %260 = vst [vmem:[#allocation2 + $0x50] sm:$0xff] %v1160_v0 }
  0x55   : > { %261 = vst [vmem:[#allocation2 + $0x68] sm:$0xff] %v1160_v0 }
  0x56   : > { %262 = vst [vmem:[#allocation2 + $0x8] sm:$0xff] %v1160_v0 }
  0x57   : > { %263 = vst [vmem:[#allocation2 + $0x48] sm:$0xff] %v1160_v0 }
  0x58   : > { %264 = vst [vmem:[#allocation2 + $0x40] sm:$0xff] %v1160_v0 }
  0x59   : > { %265 = vst [vmem:[#allocation2 + $0x20] sm:$0xff] %v1160_v0 }
  0x5a   : > { %266 = vst [vmem:[#allocation2 + $0x10] sm:$0xff] %v1160_v0 }
  0x5b   : > { %267 = vst [vmem:[#allocation2 + $0x38] sm:$0xff] %v1160_v0 }
  0x5c   : > { %268 = vst [vmem:[#allocation2 + $0x60] sm:$0xff] %v1160_v0 }
  0x5d   : > { %269 = vst [vmem:[#allocation2 + $0x70] sm:$0xff] %v1160_v0 }
  0x5e   : > { %270 = vst [vmem:[#allocation2 + $0x78] sm:$0xff] %v1160_v0 }
  0x5f   : > { %271 = vst [vmem:[#allocation2 + $0x28] sm:$0xff] %v1160_v0 }
  0x60 PF: > { %v781_v1 = vld [vmem:[%s1369_s24 + $0x38] sm:$0xff]  ;;  %v780_v2 = vld [vmem:[%s1369_s24 + $0x30] sm:$0xff]  ;;  %v779_v3 = vld [vmem:[%s1369_s24 + $0x28] sm:$0xff]  ;;  %s1519_s29 = sld [smem:[#allocation12_spill]] }
  0x61   : > { %416 = vmatpush.bf16.msra.mxu0 %v781_v1  ;;  %783 = vmatpush.bf16.msra.mxu1 %v781_v1  ;;  %v778_v4 = vld [vmem:[%s1369_s24 + $0x20] sm:$0xff]  ;;  %v777_v5 = vld [vmem:[%s1369_s24 + $0x18] sm:$0xff]  ;;  %v776_v6 = vld [vmem:[%s1369_s24 + $0x10] sm:$0xff] }
  0x62   : > { %784 = vmatpush.bf16.msra.mxu2 %v781_v1  ;;  %785 = vmatpush.bf16.msra.mxu3 %v781_v1  ;;  %v775_v7 = vld [vmem:[%s1369_s24 + $0x8] sm:$0xff]  ;;  %v774_v8 = vld [vmem:[%s1369_s24] sm:$0xff]  ;;  %v768_v10 = vld [vmem:[%s1362_s3 + $0x10] sm:$0xff] }
  0x63   : > { %v766_v9 = vld [vmem:[%s1362_s3] sm:$0xff]  ;;  %v772_v12 = vld [vmem:[%s1362_s3 + $0x30] sm:$0xff]  ;;  %v767_v13 = vld [vmem:[%s1362_s3 + $0x8] sm:$0xff] }
  0x64   : > { %v770_v11 = vld [vmem:[%s1362_s3 + $0x20] sm:$0xff]  ;;  %v769_v14 = vld [vmem:[%s1362_s3 + $0x18] sm:$0xff]  ;;  %v771_v15 = vld [vmem:[%s1362_s3 + $0x28] sm:$0xff] }
  0x65   : > { %417 = vmatpush.bf16.msra.mxu0 %v780_v2  ;;  %786 = vmatpush.bf16.msra.mxu1 %v780_v2  ;;  %v773_v16 = vld [vmem:[%s1362_s3 + $0x38] sm:$0xff]  ;;  %v272_v17 = vld [vmem:[#allocation2 + $0x30] sm:$0xff]  ;;  %v280_v23 = vld [vmem:[#allocation2 + $0x40] sm:$0xff] }
  0x66   : > { %787 = vmatpush.bf16.msra.mxu2 %v780_v2  ;;  %788 = vmatpush.bf16.msra.mxu3 %v780_v2  ;;  %v276_v18 = vld [vmem:[#allocation2 + $0x50] sm:$0xff]  ;;  %v284_v24 = vld [vmem:[#allocation2 + $0x60] sm:$0xff]  ;;  %v277_v26 = vld [vmem:[#allocation2 + $0x68] sm:$0xff]  ;;  %p758_p1 = scmp.ne.s32.totalorder %s1519_s29, 1 }
  0x67   : > { %v273_v25 = vld [vmem:[#allocation2] sm:$0xff]  ;;  %v285_v36 = vld [vmem:[#allocation2 + $0x70] sm:$0xff]  ;;  %v274_v37 = vld [vmem:[#allocation2 + $0x58] sm:$0xff]  ;;  %s1520_s30 = sld [smem:[#allocation19_spill]] (!%p758_p1) }
  0x68   : > { %v281_v35 = vld [vmem:[#allocation2 + $0x20] sm:$0xff]  ;;  %v278_v38 = vld [vmem:[#allocation2 + $0x8] sm:$0xff]  ;;  %v282_v47 = vld [vmem:[#allocation2 + $0x10] sm:$0xff] }
  0x69   : > { %418 = vmatpush.bf16.msra.mxu0 %v779_v3  ;;  %789 = vmatpush.bf16.msra.mxu1 %v779_v3  ;;  %v286_v48 = vld [vmem:[#allocation2 + $0x78] sm:$0xff]  ;;  %v279_v50 = vld [vmem:[#allocation2 + $0x48] sm:$0xff] }
  0x6a   : > { %790 = vmatpush.bf16.msra.mxu2 %v779_v3  ;;  %791 = vmatpush.bf16.msra.mxu3 %v779_v3  ;;  %v275_v49 = vld [vmem:[#allocation2 + $0x18] sm:$0xff]  ;;  %v287_v60 = vld [vmem:[#allocation2 + $0x28] sm:$0xff] }
  0x6b   : > { %v283_v59 = vld [vmem:[#allocation2 + $0x38] sm:$0xff] }
  0x6d   : > { %419 = vmatpush.bf16.msra.mxu0 %v778_v4  ;;  %792 = vmatpush.bf16.msra.mxu1 %v778_v4 }
  0x6e   : > { %793 = vmatpush.bf16.msra.mxu2 %v778_v4  ;;  %794 = vmatpush.bf16.msra.mxu3 %v778_v4 }
  0x71   : > { %420 = vmatpush.bf16.msra.mxu0 %v777_v5  ;;  %795 = vmatpush.bf16.msra.mxu1 %v777_v5 }
  0x72   : > { %796 = vmatpush.bf16.msra.mxu2 %v777_v5  ;;  %797 = vmatpush.bf16.msra.mxu3 %v777_v5 }
  0x75   : > { %421 = vmatpush.bf16.msra.mxu0 %v776_v6  ;;  %798 = vmatpush.bf16.msra.mxu1 %v776_v6 }
  0x76   : > { %799 = vmatpush.bf16.msra.mxu2 %v776_v6  ;;  %800 = vmatpush.bf16.msra.mxu3 %v776_v6 }
  0x79   : > { %422 = vmatpush.bf16.msra.mxu0 %v775_v7  ;;  %801 = vmatpush.bf16.msra.mxu1 %v775_v7 }
  0x7a   : > { %802 = vmatpush.bf16.msra.mxu2 %v775_v7  ;;  %803 = vmatpush.bf16.msra.mxu3 %v775_v7 }
  0x7d   : > { %423 = vmatpush.bf16.msra.mxu0 %v774_v8  ;;  %804 = vmatpush.bf16.msra.mxu1 %v774_v8 }
  0x7e   : > { %805 = vmatpush.bf16.msra.mxu2 %v774_v8  ;;  %806 = vmatpush.bf16.msra.mxu3 %v774_v8 }
  0x80   : > { %424 = vmatmul.bf16.vlgmr.msra.gmra.mxu0 %v766_v9  ;;  %434 = vmatmul.bf16.vlgmr.msra.gmra.mxu1 %v768_v10 }
  0x81   : > { %444 = vmatmul.bf16.vlgmr.msra.gmra.mxu2 %v770_v11  ;;  %454 = vmatmul.bf16.vlgmr.msra.gmra.mxu3 %v772_v12 }
  0x90   : > { %429 = vmatmul.bf16.gmra.mxu0 %v767_v13  ;;  %439 = vmatmul.bf16.gmra.mxu1 %v769_v14 }
  0x91   : > { %449 = vmatmul.bf16.gmra.mxu2 %v771_v15  ;;  %459 = vmatmul.bf16.gmra.mxu3 %v773_v16 }
  0xfd   : > { %v425_v19 = vpop.f32.mrf.mxu0  ;;  %v435_v20 = vpop.f32.mrf.mxu1 }
  0xfe   : > { %v465_v21 = vadd.f32 %v425_v19, %v272_v17  ;;  %v469_v22 = vadd.f32 %v435_v20, %v276_v18 }
 0x100   : > { %481 = vst [vmem:[#allocation2 + $0x30] sm:$0xff] %v465_v21 }
 0x101   : > { %485 = vst [vmem:[#allocation2 + $0x50] sm:$0xff] %v469_v22 }
 0x104   : > { %v445_v27 = vpop.f32.mrf.mxu2  ;;  %v455_v28 = vpop.f32.mrf.mxu3 }
 0x105   : > { %v473_v29 = vadd.f32 %v445_v27, %v280_v23  ;;  %v477_v30 = vadd.f32 %v455_v28, %v284_v24  ;;  %v427_v31 = vpop.f32.mrf.mxu0  ;;  %v437_v32 = vpop.f32.mrf.mxu1 }
 0x106   : > { %v466_v33 = vadd.f32 %v427_v31, %v273_v25  ;;  %v470_v34 = vadd.f32 %v437_v32, %v277_v26 }
 0x107   : > { %489 = vst [vmem:[#allocation2 + $0x40] sm:$0xff] %v473_v29 }
 0x108   : > { %493 = vst [vmem:[#allocation2 + $0x60] sm:$0xff] %v477_v30 }
 0x109   : > { %482 = vst [vmem:[#allocation2] sm:$0xff] %v466_v33 }
 0x10a   : > { %486 = vst [vmem:[#allocation2 + $0x68] sm:$0xff] %v470_v34 }
 0x10c   : > { %v447_v39 = vpop.f32.mrf.mxu2  ;;  %v457_v40 = vpop.f32.mrf.mxu3 }
 0x10d   : > { %v474_v41 = vadd.f32 %v447_v39, %v281_v35  ;;  %v478_v42 = vadd.f32 %v457_v40, %v285_v36  ;;  %v430_v43 = vpop.f32.mrf.mxu0  ;;  %v440_v44 = vpop.f32.mrf.mxu1 }
 0x10e   : > { %v467_v45 = vadd.f32 %v430_v43, %v274_v37  ;;  %v471_v46 = vadd.f32 %v440_v44, %v278_v38 }
 0x10f   : > { %490 = vst [vmem:[#allocation2 + $0x20] sm:$0xff] %v474_v41 }
 0x110   : > { %494 = vst [vmem:[#allocation2 + $0x70] sm:$0xff] %v478_v42 }
 0x111   : > { %483 = vst [vmem:[#allocation2 + $0x58] sm:$0xff] %v467_v45 }
 0x112   : > { %487 = vst [vmem:[#allocation2 + $0x8] sm:$0xff] %v471_v46 }
 0x114   : > { %v450_v51 = vpop.f32.mrf.mxu2  ;;  %v460_v52 = vpop.f32.mrf.mxu3 }
 0x115   : > { %v475_v53 = vadd.f32 %v450_v51, %v282_v47  ;;  %v479_v54 = vadd.f32 %v460_v52, %v286_v48  ;;  %v432_v55 = vpop.f32.mrf.mxu0  ;;  %v442_v56 = vpop.f32.mrf.mxu1 }
 0x116   : > { %v468_v57 = vadd.f32 %v432_v55, %v275_v49  ;;  %v472_v58 = vadd.f32 %v442_v56, %v279_v50 }
 0x117   : > { %491 = vst [vmem:[#allocation2 + $0x10] sm:$0xff] %v475_v53 }
 0x118   : > { %495 = vst [vmem:[#allocation2 + $0x78] sm:$0xff] %v479_v54 }
 0x119   : > { %484 = vst [vmem:[#allocation2 + $0x18] sm:$0xff] %v468_v57 }
 0x11a   : > { %488 = vst [vmem:[#allocation2 + $0x48] sm:$0xff] %v472_v58 }
 0x11c   : > { %v452_v61 = vpop.f32.mrf.mxu2  ;;  %v462_v62 = vpop.f32.mrf.mxu3  ;;  %500 = sbr.rel (%p758_p1) target bundleno = 308 (0x134), region = 48 }
 0x11d   : > { %v476_v63 = vadd.f32 %v452_v61, %v283_v59  ;;  %v480_v0 = vadd.f32 %v462_v62, %v287_v60 }
 0x11f   : > { %492 = vst [vmem:[#allocation2 + $0x38] sm:$0xff] %v476_v63 }
 0x120   : > { %496 = vst [vmem:[#allocation2 + $0x28] sm:$0xff] %v480_v0 }
 0x121   : > { %v501_v1 = vld [vmem:[#allocation2 + $0x30] sm:$0xff]  ;;  %v944_v2 = vld [vmem:[%s1520_s30] ss:$0 sm:$0xff]  ;;  %v503_v4 = vld [vmem:[#allocation2 + $0x58] sm:$0xff] }
 0x122   : > { %v502_v3 = vld [vmem:[#allocation2] sm:$0xff]  ;;  %v504_v5 = vld [vmem:[#allocation2 + $0x18] sm:$0xff]  ;;  %v521_v6 = vadd.f32 %v944_v2, %v501_v1  ;;  %v523_v8 = vadd.f32 %v944_v2, %v503_v4  ;;  %v505_v9 = vld [vmem:[#allocation2 + $0x50] sm:$0xff] }
 0x123   : > { %v522_v7 = vadd.f32 %v944_v2, %v502_v3  ;;  %v506_v10 = vld [vmem:[#allocation2 + $0x68] sm:$0xff]  ;;  %v524_v11 = vadd.f32 %v944_v2, %v504_v5  ;;  %v525_v13 = vadd.f32 %v944_v2, %v505_v9  ;;  %v509_v16 = vld [vmem:[#allocation2 + $0x40] sm:$0xff]  ;;  %v511_v20 = vld [vmem:[#allocation2 + $0x10] sm:$0xff] }
 0x124   : > { %v507_v12 = vld [vmem:[#allocation2 + $0x8] sm:$0xff]  ;;  %537 = vst [vmem:[%s1378_s15] sm:$0xff] %v521_v6  ;;  %v526_v15 = vadd.f32 %v944_v2, %v506_v10  ;;  %v510_v18 = vld [vmem:[#allocation2 + $0x20] sm:$0xff]  ;;  %v529_v21 = vadd.f32 %v944_v2, %v509_v16  ;;  %v531_v25 = vadd.f32 %v944_v2, %v511_v20  ;;  %v514_v26 = vld [vmem:[#allocation2 + $0x70] sm:$0xff] }
 0x125   : > { %v508_v14 = vld [vmem:[#allocation2 + $0x48] sm:$0xff]  ;;  %538 = vst [vmem:[%s1378_s15 + $0x8] sm:$0xff] %v522_v7  ;;  %v527_v17 = vadd.f32 %v944_v2, %v507_v12  ;;  %v530_v23 = vadd.f32 %v944_v2, %v510_v18  ;;  %v513_v24 = vld [vmem:[#allocation2 + $0x60] sm:$0xff]  ;;  %v515_v28 = vld [vmem:[#allocation2 + $0x78] sm:$0xff]  ;;  %v534_v31 = vadd.f32 %v944_v2, %v514_v26 }
 0x126   : > { %539 = vst [vmem:[%s1378_s15 + $0x10] sm:$0xff] %v523_v8  ;;  %v528_v19 = vadd.f32 %v944_v2, %v508_v14  ;;  %v512_v22 = vld [vmem:[#allocation2 + $0x38] sm:$0xff]  ;;  %v533_v29 = vadd.f32 %v944_v2, %v513_v24  ;;  %v535_v32 = vadd.f32 %v944_v2, %v515_v28 }
 0x127   : > { %540 = vst [vmem:[%s1378_s15 + $0x18] sm:$0xff] %v524_v11  ;;  %v532_v27 = vadd.f32 %v944_v2, %v512_v22  ;;  %v516_v30 = vld [vmem:[#allocation2 + $0x28] sm:$0xff] }
 0x128   : > { %541 = vst [vmem:[%s1378_s15 + $0x20] sm:$0xff] %v525_v13  ;;  %v536_v33 = vadd.f32 %v944_v2, %v516_v30 }
 0x129   : > { %542 = vst [vmem:[%s1378_s15 + $0x28] sm:$0xff] %v526_v15 }
 0x12a   : > { %543 = vst [vmem:[%s1378_s15 + $0x30] sm:$0xff] %v527_v17 }
 0x12b   : > { %544 = vst [vmem:[%s1378_s15 + $0x38] sm:$0xff] %v528_v19 }
 0x12c   : > { %545 = vst [vmem:[%s1378_s15 + $0x40] sm:$0xff] %v529_v21 }
 0x12d   : > { %546 = vst [vmem:[%s1378_s15 + $0x48] sm:$0xff] %v530_v23 }
 0x12e   : > { %547 = vst [vmem:[%s1378_s15 + $0x50] sm:$0xff] %v531_v25 }
 0x12f   : > { %548 = vst [vmem:[%s1378_s15 + $0x58] sm:$0xff] %v532_v27 }
 0x130   : > { %549 = vst [vmem:[%s1378_s15 + $0x60] sm:$0xff] %v533_v29 }
 0x131   : > { %550 = vst [vmem:[%s1378_s15 + $0x68] sm:$0xff] %v534_v31 }
 0x132   : > { %551 = vst [vmem:[%s1378_s15 + $0x70] sm:$0xff] %v535_v32 }
 0x133   : > { %552 = vst [vmem:[%s1378_s15 + $0x78] sm:$0xff] %v536_v33 }
 0x134 PF: > { %s1521_s28 = sld [smem:[#allocation13_spill]]  ;;  %s566_s27 = sshll.u32 %s1378_s15, 4  ;;  %s567_s27 = int_to_ptr.vmem [resolvable:$true] %s566_s27 }
 0x135   : > { %s1522_s3 = sld [smem:[#allocation20_spill]]  ;;  %s554_s24 = scalar_lea.sflag [#allocation5], %s246_s22 }
 0x13a   : > { %s782_s4 = sshll.u32 %s1521_s28, 7 }
 0x13b   : > { %s565_s21 = scalar_lea.hbm %s1522_s3, %s782_s4  ;;  %s1025_s26 = scalar_lea.hbm %s1522_s3, 256 }
 0x13c   : > { %s568_s0 = sshll.u32 %s565_s21, 4  ;;  %s569_s0 = int_to_ptr.hbm [resolvable:$true] %s568_s0 }
 0x13d   : > { %s1019_s1 = sshra.s32 %s569_s0, 4  ;;  %s1020_s1 = int_to_ptr.hbm [resolvable:$true] %s1019_s1 }
 0x13e   : > { %s1021_s6 = scalar_lea.hbm %s1020_s1, 128  ;;  %p1026_p9 = scmp.lt.s32.totalorder %s1020_s1, %s1522_s3 }
 0x13f   : > { %p1022_p3 = scmp.ne.s32.totalorder %s1020_s1, %s1021_s6  ;;  %p1027_p10 = scmp.lt.s32.totalorder %s1025_s26, %s1021_s6 }
 0x141   : > { %p1023_p4 = pnand %p1022_p3, %p1339_p5  ;;  %p1028_p11 = por %p1027_p10, %p1026_p9 }
 0x143   : > { %p1024_p8 = pneg %p1023_p4 }
 0x145   : > { %p1029_p6 = pnand %p1028_p11, %p1024_p8 }
 0x147   : > { %1032 = shalt.err (!%p1029_p6)
}
 0x148   : > { %s1161_s22 = smov 128   ;;  %s1162_s15 = smov 8  }
 0x149   : > { %811 = dma.vmem_to_hbm [thread:$0]  (%p1339_p5), %s567_s27, 2048, %s569_s0, %s554_s24, %s1161_s22, %s1161_s22, %s1162_s15  }
 0x14a PF: > { %p825_p12 = scmp.ge.s32.totalorder %s1155_s25, 2  ;;  %s583_s4 = sand.u32 1, %s1103_s12  }
 0x14b   : > { %s584_s7 = scalar_lea.sflag [#allocation5], %s583_s4 }
 0x14c   : > { %p821_p2 = pnand %p825_p12, %p1345_p7 }
 0x14e   : > { %p822_p0 = pneg %p821_p2 }
 0x150   : > { %1098 = dma.done.wait (%p822_p0), %s584_s7, 2048  }
 0x151   : > { %1100 = vsyncadd (%p822_p0), %s584_s7, 4294965248  ;;  %s22_s25 = sadd.s32 1, %s1155_s25   ;;  %s1524_s22 = sld [smem:[#allocation14_spill]] }
 0x152   : > { %p1439_p13 = scmp.ge.s32.totalorder %s22_s25, 6   ;;  %s1525_s10 = sld [smem:[#allocation15_spill]] }
 0x153   : > { %s1526_s24 = sld [smem:[#allocation16_spill]]  ;;  %s1527_s12 = smov %s1107_s13 }
 0x154   : > { %s1528_s13 = smov %s1111_s14  ;;  %s1529_s14 = smov %s1284_s8 }
 0x155   : > { %s1530_s15 = smov %s1119_s16  ;;  %s1531_s16 = smov %s1123_s17 }
 0x156   : > { %s1532_s17 = smov %s1312_s5  ;;  %s1533_s18 = smov %s1131_s19 }
 0x157   : > { %s1534_s19 = smov %s1135_s20  ;;  %s1535_s20 = smov %s1287_s9 }
 0x158   : > { %s1536_s21 = smov %s1147_s23  ;;  %s1537_s23 = smov %s1525_s10 }
 0x159   :  { %21 = sbr.rel (!%p1439_p13) target bundleno = 17 (0x11), region = 98 }
 0x15e   :  { %590 = vsyncpa [#allocation4], 1 }
 0x15f   :  { %592 = vsyncpa [#allocation4 + $0x1], 1 }
 0x160   :  { %593 = vsyncpa [#allocation7], 1 }
 0x161   :  { %595 = vsyncpa [#allocation7 + $0x1], 1 }
 0x162   :  { %596 = vsyncpa [#allocation5], 1 }
 0x163   :  { %598 = vsyncpa [#allocation5 + $0x1], 1 }

</bundles_post_ra>
